<compile_context>
chip_gen: v7x
topology: tpu7x:2x2x1
jax: 0.10.0
libtpu: 0.0.40
codegen_flags: <defaults>
</compile_context>

<pallas_src>
import functools
import math

import jax
import jax.numpy as jnp
from jax import lax
from jax.experimental import pallas as pl
from jax.experimental.pallas import tpu as pltpu

_VMEM_LIMIT = 32 * 1024 * 1024  # <= half of v7x's 64 MiB/TC; ample on v5e/v6e.


def _fit_tile(dim, target, align):
    """Largest tile <= target that divides `dim` and is a multiple of `align`.

    Falls back to the full dimension (always a legal block size) when no
    aligned divisor exists.
    TODO(synk): pad-to-multiple + masking for huge, oddly-sized axes instead
    of falling back to the full dimension.
    """
    dim = int(dim)
    target = int(target)
    if dim <= target:
        return dim
    t = (target // align) * align
    while t >= align:
        if dim % t == 0:
            return t
        t -= align
    return dim


# --------------------------- tiled linear kernel ----------------------------

def _linear_kernel(x_ref, w_ref, b_ref, o_ref, acc_ref, *, clip):
    @pl.when(pl.program_id(2) == 0)
    def _():
        acc_ref[...] = jnp.zeros_like(acc_ref)

    # x/w arrive pre-cast to bf16 (no per-tile cast pass); f32 accumulation.
    acc_ref[...] += jnp.dot(x_ref[...], w_ref[...],
                            preferred_element_type=jnp.float32)

    @pl.when(pl.program_id(2) == pl.num_programs(2) - 1)
    def _():
        y = acc_ref[...] + b_ref[...]
        if clip is not None:
            y = jnp.clip(y, -clip, clip)
        o_ref[...] = y.astype(o_ref.dtype)


def linear(x2d, w, b, *, clip=None, out_dtype=jnp.float32,
           tm=512, tn=512, tk=512):
    """y = clip(x2d @ w + b): tiled, pipelined, bf16 MXU / f32 accumulation."""
    M, K = x2d.shape
    N = w.shape[1]
    if x2d.dtype != jnp.bfloat16:
        x2d = x2d.astype(jnp.bfloat16)
    if w.dtype != jnp.bfloat16:
        w = w.astype(jnp.bfloat16)
    b = b.astype(jnp.float32).reshape(1, N)

    tm = _fit_tile(M, tm, 8)      # sublane dim of x / out blocks
    tn = _fit_tile(N, tn, 128)    # lane dim of w / out blocks
    tk = _fit_tile(K, tk, 128)    # lane dim of x block, sublane dim of w block
    grid = (M // tm, N // tn, K // tk)

    out_bytes = jnp.dtype(out_dtype).itemsize
    flops = 2 * M * N * K
    bytes_accessed = (2 * M * K * (N // tn) + 2 * K * N * (M // tm)
                      + 4 * N + out_bytes * M * N)

    return pl.pallas_call(
        functools.partial(_linear_kernel, clip=clip),
        out_shape=jax.ShapeDtypeStruct((M, N), out_dtype),
        grid_spec=pltpu.PrefetchScalarGridSpec(
            num_scalar_prefetch=0,
            grid=grid,
            in_specs=[
                pl.BlockSpec((tm, tk), lambda i, j, k: (i, k)),
                pl.BlockSpec((tk, tn), lambda i, j, k: (k, j)),
                pl.BlockSpec((1, tn), lambda i, j, k: (0, j)),
            ],
            out_specs=pl.BlockSpec((tm, tn), lambda i, j, k: (i, j)),
            scratch_shapes=[pltpu.VMEM((tm, tn), jnp.float32)],
        ),
        compiler_params=pltpu.CompilerParams(
            dimension_semantics=("parallel", "parallel", "arbitrary"),
            vmem_limit_bytes=_VMEM_LIMIT,
        ),
        cost_estimate=pl.CostEstimate(
            flops=flops, transcendentals=0, bytes_accessed=bytes_accessed),
    )(x2d, w, b)


# ----------------------- flash attention (online softmax) -------------------

def _flash_update(q, k, v, m_ref, l_ref, acc_ref, *, scale):
    """One online-softmax step over a (tkv, d) block of keys/values.

    q/k/v are bf16 (tq, d)/(tkv, d) tiles; m/l/acc scratch are f32.
    """
    @pl.when(pl.program_id(3) == 0)
    def _():
        m_ref[...] = jnp.full(m_ref.shape, -jnp.inf, dtype=m_ref.dtype)
        l_ref[...] = jnp.zeros_like(l_ref)
        acc_ref[...] = jnp.zeros_like(acc_ref)

    # Fold the softmax scale into q (Tq*d muls, not Tq*Tkv).
    q = q * scale
    # Contract the last dims directly: no k.T (no XLU transpose of the K tile).
    s = lax.dot_general(q, k, dimension_numbers=(((1,), (1,)), ((), ())),
                        preferred_element_type=jnp.float32)       # [Tq, Tkv]

    m_prev = m_ref[...]
    m_new = jnp.maximum(m_prev, jnp.max(s, axis=-1, keepdims=True))
    alpha = jnp.exp(m_prev - m_new)
    p = jnp.exp(s - m_new)                                        # f32
    l_ref[...] = alpha * l_ref[...] + jnp.sum(p, axis=-1, keepdims=True)
    # TODO(synk): batch 2-4 heads per grid step so this PV matmul's N=d_head
    #             fills the 256-wide MXU on v6e/v7x when d_head < 256.
    acc_ref[...] = alpha * acc_ref[...] + jnp.dot(
        p.astype(jnp.bfloat16), v, preferred_element_type=jnp.float32)
    m_ref[...] = m_new


def _flash_kernel_bhsd(q_ref, k_ref, v_ref, o_ref, m_ref, l_ref, acc_ref, *,
                       scale):
    """Blocks shaped (1, 1, t, d) over [B, H, S, d] arrays."""
    _flash_update(q_ref[0, 0], k_ref[0, 0], v_ref[0, 0],
                  m_ref, l_ref, acc_ref, scale=scale)

    @pl.when(pl.program_id(3) == pl.num_programs(3) - 1)
    def _():
        inv_l = pl.reciprocal(l_ref[...], approx=True)
        o_ref[0, 0] = (acc_ref[...] * inv_l).astype(o_ref.dtype)


def _flash_kernel_flat(q_ref, k_ref, v_ref, o_ref, m_ref, l_ref, acc_ref, *,
                       scale):
    """Blocks shaped (t, d) carved straight out of the flat [B*S, 3D] buffer."""
    _flash_update(q_ref[...], k_ref[...], v_ref[...],
                  m_ref, l_ref, acc_ref, scale=scale)

    @pl.when(pl.program_id(3) == pl.num_programs(3) - 1)
    def _():
        inv_l = pl.reciprocal(l_ref[...], approx=True)
        o_ref[...] = (acc_ref[...] * inv_l).astype(o_ref.dtype)


def flash_attention(q, k, v, softmax_scale, *, tq=512, tkv=512):
    """q, k, v: [B, H, S, d] bf16 -> out [B, H, S, d] bf16.  Never builds SxS."""
    B, H, S, d = q.shape
    tq = _fit_tile(S, tq, 8)
    tkv = _fit_tile(S, tkv, 8)
    grid = (B, H, S // tq, S // tkv)

    flops = 4 * B * H * S * S * d
    # q + out once, K/V re-streamed once per q tile, all bf16.
    bytes_accessed = 2 * B * H * S * d * (2 + 2 * (S // tq))

    return pl.pallas_call(
        functools.partial(_flash_kernel_bhsd, scale=softmax_scale),
        out_shape=jax.ShapeDtypeStruct((B, H, S, d), jnp.bfloat16),
        grid_spec=pltpu.PrefetchScalarGridSpec(
            num_scalar_prefetch=0,
            grid=grid,
            in_specs=[
                pl.BlockSpec((1, 1, tq, d), lambda b, h, qi, ki: (b, h, qi, 0)),
                pl.BlockSpec((1, 1, tkv, d), lambda b, h, qi, ki: (b, h, ki, 0)),
                pl.BlockSpec((1, 1, tkv, d), lambda b, h, qi, ki: (b, h, ki, 0)),
            ],
            out_specs=pl.BlockSpec((1, 1, tq, d),
                                   lambda b, h, qi, ki: (b, h, qi, 0)),
            scratch_shapes=[
                pltpu.VMEM((tq, 1), jnp.float32),   # running max
                pltpu.VMEM((tq, 1), jnp.float32),   # running sum
                pltpu.VMEM((tq, d), jnp.float32),   # output accumulator
            ],
        ),
        compiler_params=pltpu.CompilerParams(
            dimension_semantics=("parallel", "parallel", "parallel",
                                 "arbitrary"),
            vmem_limit_bytes=_VMEM_LIMIT,
        ),
        cost_estimate=pl.CostEstimate(
            flops=flops, transcendentals=B * H * S * S,
            bytes_accessed=bytes_accessed),
    )(q, k, v)


def flash_attention_fused_layout(qkv, B, S, n_heads, softmax_scale, *,
                                 tq=512, tkv=512):
    """Flash attention that reads heads directly from the flat [B*S, 3D] QKV
    buffer and writes ctx directly as [B*S, D] (no XLA transposes, lane-dense
    output).  Requires d_head % 128 == 0 (the (8,128) block rule)."""
    BS, threeD = qkv.shape
    D = threeD // 3
    H = n_heads
    d = D // H
    assert BS == B * S and d % 128 == 0
    tq = _fit_tile(S, tq, 8)
    tkv = _fit_tile(S, tkv, 8)
    qb, kb = S // tq, S // tkv
    grid = (B, H, qb, kb)

    flops = 4 * B * H * S * S * d
    bytes_accessed = 2 * B * H * S * d * (2 + 2 * qb)

    # Column-block layout of the flat QKV buffer: [ q_h0..q_hH | k_h0.. | v_h0.. ]
    q_spec = pl.BlockSpec((tq, d), lambda b, h, qi, ki: (b * qb + qi, h))
    k_spec = pl.BlockSpec((tkv, d), lambda b, h, qi, ki: (b * kb + ki, H + h))
    v_spec = pl.BlockSpec((tkv, d), lambda b, h, qi, ki: (b * kb + ki, 2 * H + h))
    o_spec = pl.BlockSpec((tq, d), lambda b, h, qi, ki: (b * qb + qi, h))

    return pl.pallas_call(
        functools.partial(_flash_kernel_flat, scale=softmax_scale),
        out_shape=jax.ShapeDtypeStruct((B * S, D), jnp.bfloat16),
        grid_spec=pltpu.PrefetchScalarGridSpec(
            num_scalar_prefetch=0,
            grid=grid,
            in_specs=[q_spec, k_spec, v_spec],
            out_specs=o_spec,
            scratch_shapes=[
                pltpu.VMEM((tq, 1), jnp.float32),
                pltpu.VMEM((tq, 1), jnp.float32),
                pltpu.VMEM((tq, d), jnp.float32),
            ],
        ),
        compiler_params=pltpu.CompilerParams(
            dimension_semantics=("parallel", "parallel", "parallel",
                                 "arbitrary"),
            vmem_limit_bytes=_VMEM_LIMIT,
        ),
        cost_estimate=pl.CostEstimate(
            flops=flops, transcendentals=B * H * S * S,
            bytes_accessed=bytes_accessed),
    )(qkv, qkv, qkv)


# --------------- attention that also returns the S x S weights --------------

def _attn_weights_kernel(q_ref, k_ref, v_ref, o_ref, w_ref, *, scale):
    q = q_ref[0, 0] * scale                             # bf16 [Tq, d]
    k = k_ref[0, 0]                                     # bf16 [S, d]
    v = v_ref[0, 0]                                     # bf16 [S, d]
    s = lax.dot_general(q, k, dimension_numbers=(((1,), (1,)), ((), ())),
                        preferred_element_type=jnp.float32)   # [Tq, S]
    m = jnp.max(s, axis=-1, keepdims=True)
    p = jnp.exp(s - m)
    # Exact normalization: the weights are a user-visible output.
    p = p / jnp.sum(p, axis=-1, keepdims=True)
    w_ref[0, 0] = p.astype(w_ref.dtype)
    o_ref[0, 0] = jnp.dot(p.astype(jnp.bfloat16), v,
                          preferred_element_type=jnp.float32).astype(o_ref.dtype)


def attention_with_weights(q, k, v, softmax_scale, *, tq=512):
    """Like flash_attention but also returns attn weights [B, H, S, S] (bf16)."""
    B, H, S, d = q.shape
    tq = _fit_tile(S, tq, 8)
    grid = (B, H, S // tq)

    flops = 4 * B * H * S * S * d
    bytes_accessed = 2 * (B * H * S * d * (1 + 2 * (S // tq) + 1)
                          + B * H * S * S)

    return pl.pallas_call(
        functools.partial(_attn_weights_kernel, scale=softmax_scale),
        out_shape=(
            jax.ShapeDtypeStruct((B, H, S, d), jnp.bfloat16),
            jax.ShapeDtypeStruct((B, H, S, S), jnp.bfloat16),
        ),
        grid_spec=pltpu.PrefetchScalarGridSpec(
            num_scalar_prefetch=0,
            grid=grid,
            in_specs=[
                pl.BlockSpec((1, 1, tq, d), lambda b, h, qi: (b, h, qi, 0)),
                pl.BlockSpec((1, 1, S, d), lambda b, h, qi: (b, h, 0, 0)),
                pl.BlockSpec((1, 1, S, d), lambda b, h, qi: (b, h, 0, 0)),
            ],
            out_specs=(
                pl.BlockSpec((1, 1, tq, d), lambda b, h, qi: (b, h, qi, 0)),
                pl.BlockSpec((1, 1, tq, S), lambda b, h, qi: (b, h, qi, 0)),
            ),
        ),
        compiler_params=pltpu.CompilerParams(
            dimension_semantics=("parallel", "parallel", "parallel"),
            vmem_limit_bytes=_VMEM_LIMIT,
        ),
        cost_estimate=pl.CostEstimate(
            flops=flops, transcendentals=B * H * S * S,
            bytes_accessed=bytes_accessed),
    )(q, k, v)


# ----------------------------- module wrapper -------------------------------

def init_params(key, d_model):
    """nn.Linear-style init (uniform +/- 1/sqrt(fan_in))."""
    k1, k2, k3, k4 = jax.random.split(key, 4)
    bound = 1.0 / math.sqrt(d_model)
    return dict(
        wqkv_w=jax.random.uniform(k1, (d_model, 3 * d_model), jnp.float32,
                                  -bound, bound),
        wqkv_b=jax.random.uniform(k2, (3 * d_model,), jnp.float32,
                                  -bound, bound),
        out_w=jax.random.uniform(k3, (d_model, d_model), jnp.float32,
                                 -bound, bound),
        out_b=jax.random.uniform(k4, (d_model,), jnp.float32, -bound, bound),
    )


def multihead_attention_forward(params, x, n_heads, softmax_scale=None,
                                clip_qkv=None, needs_weights=False):
    """Reproduces MultiheadAttention.forward (attn_pdrop=0, qk_ln=False)."""
    B, S, D = x.shape
    d_head = D // n_heads
    if softmax_scale is None:
        softmax_scale = 1.0 / math.sqrt(D / n_heads)

    # One-time bf16 casts of the weights (halves weight DMA inside the linears).
    wqkv_w = params["wqkv_w"].astype(jnp.bfloat16)
    out_w = params["out_w"].astype(jnp.bfloat16)

    # QKV projection: bf16 in / bf16 out; clip_qkv fused into the epilogue.
    qkv = linear(x.astype(jnp.bfloat16).reshape(B * S, D), wqkv_w,
                 params["wqkv_b"], clip=(clip_qkv if clip_qkv else None),
                 out_dtype=jnp.bfloat16)

    if needs_weights:
        # Debug path: also materializes the [B,H,S,S] weights (bf16).
        qkv4 = qkv.reshape(B, S, 3, n_heads, d_head).transpose(2, 0, 3, 1, 4)
        q, k, v = qkv4[0], qkv4[1], qkv4[2]
        ctx, attn_weights = attention_with_weights(q, k, v, softmax_scale)
        ctx = ctx.transpose(0, 2, 1, 3).reshape(B * S, D)
    elif d_head % 128 == 0:
        # Transpose-free path: heads are addressed straight in the flat
        # [B*S, 3D] / [B*S, D] layouts via BlockSpec index maps.
        ctx = flash_attention_fused_layout(qkv, B, S, n_heads, softmax_scale)
        attn_weights = None
    else:
        # d_head < 128: the (8,128) rule forbids head-column blocks, so keep
        # the (now bf16, half-traffic) XLA transposes around the flash kernel.
        qkv4 = qkv.reshape(B, S, 3, n_heads, d_head).transpose(2, 0, 3, 1, 4)
        q, k, v = qkv4[0], qkv4[1], qkv4[2]
        ctx = flash_attention(q, k, v, softmax_scale)
        ctx = ctx.transpose(0, 2, 1, 3).reshape(B * S, D)
        attn_weights = None

    out = linear(ctx, out_w, params["out_b"], out_dtype=jnp.float32)
    return out.reshape(B, S, D), attn_weights, None


# --------------------------------- main --------------------------------------

def _reference_forward(params, x, n_heads):
    """Pure-JAX f32 reference."""
    B, S, D = x.shape
    d = D // n_heads
    scale = 1.0 / math.sqrt(d)
    qkv = x.reshape(B * S, D) @ params["wqkv_w"] + params["wqkv_b"]
    qkv = qkv.reshape(B, S, 3, n_heads, d).transpose(2, 0, 3, 1, 4)
    q, k, v = qkv[0], qkv[1], qkv[2]
    s = jnp.einsum("bhqd,bhkd->bhqk", q, k) * scale
    p = jax.nn.softmax(s, axis=-1)
    o = jnp.einsum("bhqk,bhkd->bhqd", p, v)
    o = o.transpose(0, 2, 1, 3).reshape(B * S, D)
    out = o @ params["out_w"] + params["out_b"]
    return out.reshape(B, S, D), p


if __name__ == "__main__":
    key = jax.random.PRNGKey(0)
    kx, kp, kx2, kp2, kx3, kp3 = jax.random.split(key, 6)

    # --- small shapes (blocks == full arrays; d_head=8 fallback path) ---
    B, S, D, H = 2, 8, 32, 4
    x = jax.random.normal(kx, (B, S, D), dtype=jnp.float32)
    params = init_params(kp, D)

    out_w, attn_w, _ = multihead_attention_forward(
        params, x, n_heads=H, needs_weights=True)
    out_fast, _, _ = multihead_attention_forward(
        params, x, n_heads=H, needs_weights=False)
    jax.block_until_ready((out_w, attn_w, out_fast))

    ref_out, ref_p = _reference_forward(params, x, H)
    # Tolerances account for bf16 streaming (f32 accumulation everywhere).
    assert jnp.allclose(out_w, ref_out, atol=5e-2, rtol=5e-2)
    assert jnp.allclose(out_fast, ref_out, atol=5e-2, rtol=5e-2)
    assert jnp.allclose(attn_w.astype(jnp.float32), ref_p, atol=5e-2, rtol=5e-2)

    # --- d_head=64: bf16-transpose fallback path with a real tiling grid ---
    B2, S2, D2, H2 = 2, 1024, 256, 4
    x2 = jax.random.normal(kx2, (B2, S2, D2), dtype=jnp.float32)
    params2 = init_params(kp2, D2)
    out2, _, _ = multihead_attention_forward(
        params2, x2, n_heads=H2, needs_weights=False)
    jax.block_until_ready(out2)
    ref_out2, _ = _reference_forward(params2, x2, H2)
    assert jnp.allclose(out2, ref_out2, atol=5e-2, rtol=5e-2)

    # --- d_head=128: transpose-free fused-layout flash path ---
    B3, S3, D3, H3 = 2, 1024, 256, 2
    x3 = jax.random.normal(kx3, (B3, S3, D3), dtype=jnp.float32)
    params3 = init_params(kp3, D3)
    out3, _, _ = multihead_attention_forward(
        params3, x3, n_heads=H3, needs_weights=False)
    jax.block_until_ready(out3)
    ref_out3, _ = _reference_forward(params3, x3, H3)
    assert jnp.allclose(out3, ref_out3, atol=5e-2, rtol=5e-2)

    print("KERNEL_OK")
</pallas_src>

<mosaic_0001>
module attributes {stable_mosaic.version = 11 : i64} {
  func.func @_linear_kernel(%arg0: i32, %arg1: i32, %arg2: i32, %arg3: memref<16x32xbf16, #tpu.memory_space<vmem>>, %arg4: memref<32x96xbf16, #tpu.memory_space<vmem>>, %arg5: memref<1x96xf32, #tpu.memory_space<vmem>>, %arg6: memref<16x96xbf16, #tpu.memory_space<vmem>>, %arg7: memref<16x96xf32, #tpu.memory_space<vmem>>) attributes {dimension_semantics = [#tpu.dimension_semantics<parallel>, #tpu.dimension_semantics<parallel>, #tpu.dimension_semantics<arbitrary>], iteration_bounds = array<i64: 1, 1, 1>, scalar_prefetch = 0 : i64, scratch_operands = 1 : i64, tpu.core_type = #tpu.core_type<tc>, window_params = [{transform_indices = @transform_0, window_bounds = array<i64: 16, 32>}, {transform_indices = @transform_1, window_bounds = array<i64: 32, 96>}, {transform_indices = @transform_2, window_bounds = array<i64: 1, 96>}, {transform_indices = @transform_3, window_bounds = array<i64: 16, 96>}]} {
    %c0_i32 = arith.constant 0 : i32
    %0 = arith.cmpi eq, %arg2, %c0_i32 : i32
    %1 = arith.extui %0 : i1 to i32
    %c0_i32_0 = arith.constant 0 : i32
    %2 = arith.cmpi ne, %1, %c0_i32_0 : i32
    scf.if %2 {
      %cst_10 = arith.constant 0.000000e+00 : f32
      %12 = vector.broadcast %cst_10 : f32 to vector<16x96xf32>
      %c0_11 = arith.constant 0 : index
      %c0_12 = arith.constant 0 : index
      %13 = vector.load %arg7[%c0_11, %c0_12] : memref<16x96xf32, #tpu.memory_space<vmem>>, vector<16x96xf32>
      tpu.vector_store %arg7[%c0_11, %c0_12], %12 {strides = array<i32>} : memref<16x96xf32, #tpu.memory_space<vmem>>, vector<16x96xf32>,
    } else {
    }
    %c0 = arith.constant 0 : index
    %c0_1 = arith.constant 0 : index
    %3 = vector.load %arg7[%c0, %c0_1] : memref<16x96xf32, #tpu.memory_space<vmem>>, vector<16x96xf32>
    %c0_2 = arith.constant 0 : index
    %c0_3 = arith.constant 0 : index
    %4 = vector.load %arg3[%c0_2, %c0_3] : memref<16x32xbf16, #tpu.memory_space<vmem>>, vector<16x32xbf16>
    %c0_4 = arith.constant 0 : index
    %c0_5 = arith.constant 0 : index
    %5 = vector.load %arg4[%c0_4, %c0_5] : memref<32x96xbf16, #tpu.memory_space<vmem>>, vector<32x96xbf16>
    %cst = arith.constant dense<0.000000e+00> : vector<16x96xf32>
    %6 = tpu.matmul %4, %5, %cst {dimension_numbers = #tpu.dot_dimension_numbers<[1], [0], [0], [1], [0, 0, 1, 1], [], []>} : vector<16x32xbf16>, vector<32x96xbf16>, vector<16x96xf32> -> vector<16x96xf32>
    %7 = arith.addf %3, %6 : vector<16x96xf32>
    %c0_6 = arith.constant 0 : index
    %c0_7 = arith.constant 0 : index
    %8 = vector.load %arg7[%c0_6, %c0_7] : memref<16x96xf32, #tpu.memory_space<vmem>>, vector<16x96xf32>
    tpu.vector_store %arg7[%c0_6, %c0_7], %7 {strides = array<i32>} : memref<16x96xf32, #tpu.memory_space<vmem>>, vector<16x96xf32>,
    %c0_i32_8 = arith.constant 0 : i32
    %9 = arith.cmpi eq, %arg2, %c0_i32_8 : i32
    %10 = arith.extui %9 : i1 to i32
    %c0_i32_9 = arith.constant 0 : i32
    %11 = arith.cmpi ne, %10, %c0_i32_9 : i32
    scf.if %11 {
      %c0_10 = arith.constant 0 : index
      %c0_11 = arith.constant 0 : index
      %12 = vector.load %arg7[%c0_10, %c0_11] : memref<16x96xf32, #tpu.memory_space<vmem>>, vector<16x96xf32>
      %c0_12 = arith.constant 0 : index
      %c0_13 = arith.constant 0 : index
      %13 = vector.load %arg5[%c0_12, %c0_13] : memref<1x96xf32, #tpu.memory_space<vmem>>, vector<1x96xf32>
      %14 = vector.broadcast %13 : vector<1x96xf32> to vector<16x96xf32>
      %15 = arith.addf %12, %14 : vector<16x96xf32>
      %16 = arith.truncf %15 : vector<16x96xf32> to vector<16x96xbf16>
      %c0_14 = arith.constant 0 : index
      %c0_15 = arith.constant 0 : index
      %17 = vector.load %arg6[%c0_14, %c0_15] : memref<16x96xbf16, #tpu.memory_space<vmem>>, vector<16x96xbf16>
      tpu.vector_store %arg6[%c0_14, %c0_15], %16 {strides = array<i32>} : memref<16x96xbf16, #tpu.memory_space<vmem>>, vector<16x96xbf16>,
    } else {
    }
    return
  }
  func.func @transform_0(%arg0: i32, %arg1: i32, %arg2: i32) -> (i32, i32) {
    %c0_i32 = arith.constant 0 : i32
    return %arg0, %arg2 : i32, i32
  }
  func.func @transform_1(%arg0: i32, %arg1: i32, %arg2: i32) -> (i32, i32) {
    %c0_i32 = arith.constant 0 : i32
    return %arg2, %arg1 : i32, i32
  }
  func.func @transform_2(%arg0: i32, %arg1: i32, %arg2: i32) -> (i32, i32) {
    %c0_i32 = arith.constant 0 : i32
    %c0_i32_0 = arith.constant 0 : i32
    return %c0_i32, %arg1 : i32, i32
  }
  func.func @transform_3(%arg0: i32, %arg1: i32, %arg2: i32) -> (i32, i32) {
    %c0_i32 = arith.constant 0 : i32
    return %arg0, %arg1 : i32, i32
  }
}

</mosaic_0001>

<bundles_post_ra>
// kernel: tpu_custom_call.1
= control target key start
LH: loop header
LB: loop body
LE: loop exit
PB: predicated region body
PF: predicated region fallthrough
CT: control target
= control target key end

     0   :  { %8 = vsyncpa [#allocation4], 0  ;;  %s350_s0 = inlined_call_operand.hbm [shape: bf16[16,32], index: 0, kind: input, shape index: {}]   ;;  %s351_s1 = inlined_call_operand.hbm [shape: bf16[32,96], index: 1, kind: input, shape index: {}]   ;;  %s352_s2 = inlined_call_operand.vmem [shape: f32[1,96], index: 2, kind: input, shape index: {}]   ;;  %s353_s3 = inlined_call_operand.hbm [shape: bf16[16,96], index: 3, kind: output, shape index: {}]  }
   0x1   :  { %9 = vsyncpa [#allocation7], 0 }
   0x2   :  { %10 = vsyncpa [#allocation5], 0  ;;  %s271_s12 = smov [#allocation3]   ;;  %s199_s16 = scalar_lea.hbm %s350_s0, 128 }
   0x3   :  { %s16_s13 = sshll.u32 %s271_s12, 4  ;;  %p200_p0 = scmp.ne.s32.totalorder %s350_s0, %s199_s16  ;;  %s17_s13 = int_to_ptr.vmem [resolvable:$true] %s16_s13 }
   0x4   :  { %p203_p1 = scmp.lt.u32.totalorder %s199_s16, %s350_s0 }
   0x6   :  { %p205_p2 = pnand %p203_p1, %p200_p0 }
   0x8   :  { %208 = shalt.err (!%p205_p2)
}
   0x9   :  { %s209_s21 = scalar_lea.vmem %s17_s13, 128  ;;  %p214_p4 = scmp.lt.s32.totalorder %s17_s13, %s17_s13 }
   0xa   :  { %p210_p3 = scmp.ne.s32.totalorder %s17_s13, %s209_s21  ;;  %p215_p5 = scmp.lt.s32.totalorder %s209_s21, %s209_s21 }
   0xc   :  { %p216_p6 = por %p215_p5, %p214_p4 }
   0xe   :  { %p217_p7 = pnand %p216_p6, %p210_p3 }
  0x10   :  { %220 = shalt.err (!%p217_p7)
}
  0x11   :  { %s272_s22 = smov 64   ;;  %s273_s23 = smov 4  }
  0x12   :  { %22 = dma.hbm_to_vmem [thread:$0]  %s350_s0, 128, %s17_s13, [#allocation4], %s272_s22, %s272_s22, %s273_s23  }
  0x13   :  { %s274_s26 = smov [#allocation6]   ;;  %s221_s30 = scalar_lea.hbm %s351_s1, 256 }
  0x14   :  { %s28_s27 = sshll.u32 %s274_s26, 4  ;;  %p222_p8 = scmp.ne.s32.totalorder %s351_s1, %s221_s30  ;;  %s29_s27 = int_to_ptr.vmem [resolvable:$true] %s28_s27 }
  0x15   :  { %p225_p9 = scmp.lt.u32.totalorder %s221_s30, %s351_s1 }
  0x17   :  { %p227_p10 = pnand %p225_p9, %p222_p8 }
  0x19   :  { %230 = shalt.err (!%p227_p10)
}
  0x1a   :  { %s231_s8 = scalar_lea.vmem %s29_s27, 256  ;;  %p236_p12 = scmp.lt.s32.totalorder %s29_s27, %s29_s27 }
  0x1b   :  { %p232_p11 = scmp.ne.s32.totalorder %s29_s27, %s231_s8  ;;  %p237_p13 = scmp.lt.s32.totalorder %s231_s8, %s231_s8 }
  0x1d   :  { %p238_p0 = por %p237_p13, %p236_p12 }
  0x1f   :  { %p239_p1 = pnand %p238_p0, %p232_p11 }
  0x21   :  { %242 = shalt.err (!%p239_p1)
}
  0x22   :  { %34 = dma.hbm_to_vmem [thread:$0]  %s351_s1, 256, %s29_s27, [#allocation7], %s272_s22, %s272_s22, %s273_s23  }
  0x23   :  { %265 = dma.done.wait [#allocation4], 128  }
  0x24   :  { %266 = vsyncadd [#allocation4], 4294967168 }
  0x25   :  { %267 = dma.done.wait [#allocation7], 256  }
  0x26   :  { %268 = vsyncadd [#allocation7], 4294967040  ;;  %vm48_vm0 = vcmask 785408   ;;  %v275_v0 = vmov 0.0   ;;  %vm276_vm1 = vmmov 0   ;;  %v196_v1 = vld [vmem:[#allocation6] sm:$0xff]  }
  0x27   :  { %49 = vst.msk [vmem:[#allocation2] sm:$0xff] %vm48_vm0, %v275_v0  ;;  %50 = vst.msk [vmem:[#allocation2 + $0x8] sm:$0xff] %vm48_vm0, %v275_v0  ;;  %181 = vmatprep.subr.bf16.mxu0 %v275_v0  ;;  %185 = vmatprep.mubr.msk.bf16.mxu0 %vm276_vm1, %v275_v0  ;;  %v197_v2 = vld [vmem:[#allocation6 + $0x8] sm:$0xff]   ;;  %v198_v3 = vld [vmem:[#allocation3] sm:$0xff]   ;;  %vm76_vm2 = vcmask 261120   ;;  %vm148_vm3 = vcmask 781312  }
  0x28   :  { %182 = vmatpush3.bf16.msra.mxu0 %v196_v1  ;;  %v173_v12 = vld [vmem:[%s352_s2] ss:$0 sm:$0xff]  ;;  %s277_s11 = smov [#allocation8]  }
  0x29   :  { %183 = vmatprep.subr.bf16.mxu0 %v275_v0  ;;  %s156_s12 = sshll.u32 %s277_s11, 4  ;;  %s157_s12 = int_to_ptr.vmem [resolvable:$true] %s156_s12 }
  0x2a   :  { %s243_s13 = scalar_lea.vmem %s157_s12, 128  ;;  %p248_p3 = scmp.lt.s32.totalorder %s157_s12, %s157_s12 }
  0x2b   :  { %p244_p2 = scmp.ne.s32.totalorder %s157_s12, %s243_s13  ;;  %p249_p4 = scmp.lt.s32.totalorder %s243_s13, %s243_s13 }
  0x2c   :  { %184 = vmatpush3.bf16.msra.mxu0 %v197_v2 }
  0x2d   :  { %p250_p5 = por %p249_p4, %p248_p3 }
  0x2e   :  { %v51_v4 = vld [vmem:[#allocation2] sm:$0xff]  ;;  %v52_v6 = vld [vmem:[#allocation2 + $0x8] sm:$0xff] }
  0x2f   :  { %186 = vmatmul.mubr.msk.bf16.vlgmr.msra.gmra.mrb[0].mxu0 %vm76_vm2, %v198_v3  ;;  %p251_p6 = pnand %p250_p5, %p244_p2 }
 0x102   :  { %v114_v5 = vpop.f32.mrb[0].mxu0 }
 0x103   :  { %v121_v7 = vadd.f32 %v114_v5, %v51_v4  ;;  %v187_v8 = vpop.f32.mrb[1].mxu0 }
 0x104   :  { %v117_v9 = vpop.f32.mrb[2].mxu0 }
 0x105   :  { %124 = vst.msk [vmem:[#allocation2] sm:$0xff] %vm48_vm0, %v121_v7  ;;  %v122_v10 = vadd.f32 %v117_v9, %v52_v6  ;;  %v188_v11 = vpop.f32.mrb[3].mxu0 }
 0x107   :  { %125 = vst.msk [vmem:[#allocation2 + $0x8] sm:$0xff] %vm48_vm0, %v122_v10 }
 0x10c   :  { %v129_v13 = vld [vmem:[#allocation2] sm:$0xff] }
 0x10d   :  { %v138_v14 = vadd.f32 %v173_v12, %v129_v13 }
 0x10e   :  { %v130_v15 = vld [vmem:[#allocation2 + $0x8] sm:$0xff] }
 0x10f   :  { %v139_v16 = vadd.f32 %v173_v12, %v130_v15  ;;  %v176_v17 = vpack.c.bf16 %v138_v14, %v138_v14 }
 0x111   :  { %v177_v18 = vpack.c.bf16 %v139_v16, %v139_v16  ;;  %149 = vst.msk [vmem:[#allocation8] sm:$0xf] %vm148_vm3, %v176_v17 }
 0x113   :  { %150 = vst.msk [vmem:[#allocation8 + $0x4] sm:$0xf] %vm148_vm3, %v177_v18 }
 0x114   :  { %254 = shalt.err (!%p251_p6)
}
 0x115   :  { %s255_s15 = scalar_lea.hbm %s353_s3, 128 }
 0x116   :  { %p256_p7 = scmp.ne.s32.totalorder %s353_s3, %s255_s15  ;;  %p259_p8 = scmp.lt.u32.totalorder %s255_s15, %s353_s3 }
 0x118   :  { %p261_p9 = pnand %p259_p8, %p256_p7 }
 0x11a   :  { %264 = shalt.err (!%p261_p9)
}
 0x11b   :  { %162 = dma.vmem_to_hbm [thread:$0]  %s157_s12, 128, %s353_s3, [#allocation5], %s272_s22, %s272_s22, %s273_s23  }
 0x11c   :  { %269 = dma.done.wait [#allocation5], 128  }
 0x11d   :  { %270 = vsyncadd [#allocation5], 4294967168 }
 0x11e   :  { %166 = vsyncpa [#allocation4], 1 }
 0x11f   :  { %167 = vsyncpa [#allocation7], 1 }
 0x120   :  { %168 = vsyncpa [#allocation5], 1 }

</bundles_post_ra>
